<compile_context>
chip_gen: v7x
topology: tpu7x:2x2x1
jax: 0.10.0
libtpu: 0.0.40
codegen_flags: <defaults>
</compile_context>

<pallas_src>
import math

import jax
import jax.numpy as jnp
from jax.experimental import pallas as pl
from jax.experimental.pallas import tpu as pltpu


_LINEAR_TILE_M = 512
_LINEAR_TILE_N = 1024
_VMEM_LIMIT_CACHE = None


def _vmem_limit():
    """Per-generation VMEM budget: ~3/4 of physical (96MiB on v5e/v6e, 48MiB on v7x)."""
    global _VMEM_LIMIT_CACHE
    if _VMEM_LIMIT_CACHE is None:
        try:
            cap = pltpu.get_tpu_info().vmem_capacity_bytes
            _VMEM_LIMIT_CACHE = int(min(112 * 1024 * 1024, (cap * 3) // 4))
        except Exception:
            _VMEM_LIMIT_CACHE = 48 * 1024 * 1024
    return _VMEM_LIMIT_CACHE


# ----------------------------------------------------------------------------
# Tiled linear (GEMM) kernel
# ----------------------------------------------------------------------------

def _linear_kernel(x_ref, w_ref, b_ref, o_ref):
    o_ref[...] = (
        jnp.dot(x_ref[...], w_ref[...], preferred_element_type=jnp.float32)
        + b_ref[...]
    )


def pallas_linear(x2d, w_t, bias, tile_m=_LINEAR_TILE_M, tile_n=_LINEAR_TILE_N):
    """x2d: (M, K), w_t: (K, Nout), bias: (Nout,) -> (M, Nout), all f32."""
    M, K = x2d.shape
    n_out = w_t.shape[1]

    # Row tile: prefer a multiple-of-8 divisor of M (no jnp.pad HBM round trip).
    if M <= tile_m:
        tm, m_pad = M, 0
    else:
        tm, m_pad = 0, 0
        t = (tile_m // 8) * 8
        while t >= 8:
            if M % t == 0:
                tm = t
                break
            t -= 8
        if tm == 0:                              # rare fallback: pad the tail
            tm = (tile_m // 8) * 8
            m_pad = pl.cdiv(M, tm) * tm - M

    # Column tile: full n_out unless large; then a multiple-of-128 divisor so the
    # resident weight block stays small on v7x's 64 MiB VMEM.
    if n_out <= tile_n:
        tn = n_out
    else:
        tn = n_out
        t = (tile_n // 128) * 128
        while t >= 128:
            if n_out % t == 0:
                tn = t
                break
            t -= 128

    x_in = jnp.pad(x2d, ((0, m_pad), (0, 0))) if m_pad else x2d
    mp = M + m_pad
    grid = (mp // tm, n_out // tn)

    out = pl.pallas_call(
        _linear_kernel,
        grid_spec=pltpu.PrefetchScalarGridSpec(
            num_scalar_prefetch=0,
            grid=grid,
            in_specs=[
                pl.BlockSpec((tm, K), lambda i, j: (i, 0)),   # streamed rows
                pl.BlockSpec((K, tn), lambda i, j: (0, j)),   # weight column tile
                pl.BlockSpec((1, tn), lambda i, j: (0, j)),   # bias tile
            ],
            out_specs=pl.BlockSpec((tm, tn), lambda i, j: (i, j)),
        ),
        out_shape=jax.ShapeDtypeStruct((mp, n_out), jnp.float32),
        compiler_params=pltpu.CompilerParams(
            dimension_semantics=("parallel", "parallel"),
            vmem_limit_bytes=_vmem_limit(),
        ),
    )(x_in, w_t, bias.reshape(1, n_out))
    return out[:M] if m_pad else out


# ----------------------------------------------------------------------------
# Fused attention kernel: linear_g + attention + linear_update, TB frames/step
# ----------------------------------------------------------------------------

def _make_attention_kernel(TB, N, H, d_k, E):
    D = H * d_k
    scale = 1.0 / math.sqrt(d_k)

    def kernel(qkv_ref,            # (TB, N, 3D)   q|k|v lane blocks, heads contiguous
               sp_ref,             # (TB, N, N*E)  edge features, (n2, e) minor
               mask_ref,           # (TB, 1, 1)    per-frame mask as f32
               mall_ref,           # (N*E, H*N)    block-diag linear_g weight
               bg_ref,             # (1, H*N)      linear_g bias (repeated per n2)
               uall_ref,           # (H*N, N*E)    block-diag linear_update weight
               bupd_ref,           # (1, N*E)      linear_update bias (tiled per n2)
               x_ref,              # out (TB, N, D)
               spo_ref,            # out (TB, N, N*E)
               s_cat):             # scratch (TB*N, H*N): post-fill scores, all heads
        qkv = qkv_ref[...]
        frame_on = mask_ref[...] != 0.0                       # (TB, 1, 1)

        # --- linear_g for all frames & heads in ONE GEMM ---
        #   G[(b,n1), h*N + n2] = sum_e sp[b,n1,n2,e] * w_g[e,h] + b_g[h]
        sp2 = sp_ref[...].reshape(TB * N, N * E)
        G = (jnp.dot(sp2, mall_ref[...], preferred_element_type=jnp.float32)
             + bg_ref[...])                                   # (TB*N, H*N)

        for h in range(H):                                    # static, H is small
            q_h = qkv[:, :, h * d_k:(h + 1) * d_k]            # (TB, N, d_k)
            k_h = qkv[:, :, D + h * d_k:D + (h + 1) * d_k]
            v_h = qkv[:, :, 2 * D + h * d_k:2 * D + (h + 1) * d_k]
            g_h = G[:, h * N:(h + 1) * N].reshape(TB, N, N)

            s_h = jnp.einsum("bnd,bmd->bnm", q_h, k_h,
                             preferred_element_type=jnp.float32) * scale + g_h
            s_h = jnp.clip(s_h, -5.0, 5.0)
            s_h = jnp.where(frame_on, s_h, jnp.float32(1e-28))
            # stash post-fill scores (these feed linear_update, like the reference)
            s_cat[:, h * N:(h + 1) * N] = s_h.reshape(TB * N, N)

            m = jnp.max(s_h, axis=-1, keepdims=True)
            p = jnp.exp(s_h - m)
            attn = p * pl.reciprocal(jnp.sum(p, axis=-1, keepdims=True), approx=True)
            attn = jnp.where(frame_on, attn, 0.0)
            # TODO(synk): attn_dropout omitted (eval-mode identity, no RNG dropout).

            x_h = jnp.einsum("bnm,bmd->bnd", attn, v_h,
                             preferred_element_type=jnp.float32)
            x_ref[:, :, h * d_k:(h + 1) * d_k] = x_h          # '(h d1)' lane order

        # --- linear_update for all frames & heads in ONE GEMM ---
        #   spo[(b,n1), n2*E + e] = sum_h scores_h[b,n1,n2] * w_upd[h,e] + b_upd[e]
        spo = (jnp.dot(s_cat[...], uall_ref[...], preferred_element_type=jnp.float32)
               + bupd_ref[...])                               # (TB*N, N*E)
        spo_ref[...] = spo.reshape(TB, N, N * E)

    return kernel


def _pick_frame_batch(BT, N, D, E, cap=128):
    """Frames per grid step: VMEM-budgeted, divides BT, keeps >=2 grid steps."""
    per_frame = N * (4 * D + 2 * N * E) * 4          # qkv + x + sp + spo, f32 bytes
    budget = _vmem_limit() // 4                      # headroom for double buffering
    tb_max = int(max(1, min(cap, budget // max(per_frame, 1))))
    if BT > 1:
        tb_max = min(tb_max, max(1, BT // 2))
    tb_max = max(1, min(tb_max, BT))
    for tb in range(tb_max, 0, -1):
        if BT % tb == 0:
            return tb
    return 1


def attention_pallas(qkv, sp_in, mask_f, m_all, bg_rep, u_all, bupd_rep,
                     *, N, H, d_k, E):
    BT = qkv.shape[0]
    D = H * d_k
    TB = _pick_frame_batch(BT, N, D, E)
    grid = (BT // TB,)

    frame_idx = lambda i: (i, 0, 0)
    full2d = lambda i: (0, 0)

    x, spo = pl.pallas_call(
        _make_attention_kernel(TB, N, H, d_k, E),
        grid_spec=pltpu.PrefetchScalarGridSpec(
            num_scalar_prefetch=0,
            grid=grid,
            in_specs=[
                pl.BlockSpec((TB, N, 3 * D), frame_idx),     # qkv
                pl.BlockSpec((TB, N, N * E), frame_idx),     # sp
                pl.BlockSpec((TB, 1, 1), frame_idx),         # frame mask
                pl.BlockSpec((N * E, H * N), full2d),        # linear_g block weight
                pl.BlockSpec((1, H * N), full2d),            # linear_g bias (repeated)
                pl.BlockSpec((H * N, N * E), full2d),        # linear_update block weight
                pl.BlockSpec((1, N * E), full2d),            # linear_update bias (tiled)
            ],
            out_specs=(
                pl.BlockSpec((TB, N, D), frame_idx),         # x, lane-dense (N, D)
                pl.BlockSpec((TB, N, N * E), frame_idx),     # sp_out, lane-dense (N, N*E)
            ),
            scratch_shapes=[pltpu.VMEM((TB * N, H * N), jnp.float32)],
        ),
        out_shape=(
            jax.ShapeDtypeStruct((BT, N, D), jnp.float32),
            jax.ShapeDtypeStruct((BT, N, N * E), jnp.float32),
        ),
        compiler_params=pltpu.CompilerParams(
            dimension_semantics=("parallel",),
            vmem_limit_bytes=_vmem_limit(),
        ),
    )(qkv, sp_in, mask_f, m_all, bg_rep, u_all, bupd_rep)
    return x, spo


# ----------------------------------------------------------------------------
# Module forward (glue: reshapes + weight prep; compute: Pallas kernels)
# ----------------------------------------------------------------------------

def spatial_attention_forward(params, node, sp, mask):
    B, T, N, D = node.shape
    E = sp.shape[-1]
    H = params["heads"]
    d_k = D // H
    BT = B * T

    # ---- kernel-ready weight prep (all weight-sized; hoist to param-prep in prod) ----
    # qkv column permutation: PyTorch '(h d1 x)' -> '(x h d1)' so q|k|v are
    # contiguous lane blocks with contiguous per-head d_k sub-blocks.
    xg, hg, dg = jnp.meshgrid(jnp.arange(3), jnp.arange(H), jnp.arange(d_k),
                              indexing="ij")
    perm = (hg * (d_k * 3) + dg * 3 + xg).reshape(-1)
    w_qkv_p = params["w_qkv_t"][:, perm]
    b_qkv_p = params["b_qkv"][perm]

    eyeN = jnp.eye(N, dtype=jnp.float32)
    # linear_g as a block-diagonal GEMM weight: (N*E, H*N)
    m_all = jnp.einsum("eh,nm->nehm", params["w_g_t"], eyeN).reshape(N * E, H * N)
    bg_rep = jnp.repeat(params["b_g"], N).reshape(1, H * N)
    # linear_update as a block-diagonal GEMM weight: (H*N, N*E)
    u_all = jnp.einsum("he,nm->hnme", params["w_upd_t"], eyeN).reshape(H * N, N * E)
    bupd_rep = jnp.tile(params["b_upd"], N).reshape(1, N * E)

    # ---- linear_qkv (tiled GEMM); output stays (BT, N, 3D): no HBM transpose ----
    qkv = pallas_linear(node.reshape(BT * N, D), w_qkv_p, b_qkv_p)
    qkv = qkv.reshape(BT, N, 3 * D)

    sp_in = sp.reshape(BT, N, N * E)
    mask_f = mask.reshape(BT, 1, 1).astype(jnp.float32)

    # ---- fused linear_g + attention + linear_update ----
    x, spo = attention_pallas(qkv, sp_in, mask_f, m_all, bg_rep, u_all, bupd_rep,
                              N=N, H=H, d_k=d_k, E=E)

    # x already has '(h d1)' lane order -> output projection is a plain GEMM.
    x_out = pallas_linear(x.reshape(BT * N, D), params["w_out_t"], params["b_out"])
    x_out = x_out.reshape(B, T, N, D)
    sp_out = spo.reshape(B, T, N, N, E)
    return x_out, sp_out


# ----------------------------------------------------------------------------
# Deterministic parameter init + pure-JAX reference
# ----------------------------------------------------------------------------

def init_params(key, node_dim, edge_dim, heads):
    ks = jax.random.split(key, 8)

    def lin(kw, kb, fan_in, fan_out):
        s = 1.0 / math.sqrt(fan_in)
        w_t = jax.random.uniform(kw, (fan_in, fan_out), jnp.float32, -s, s)
        b = jax.random.uniform(kb, (fan_out,), jnp.float32, -s, s)
        return w_t, b

    w_qkv_t, b_qkv = lin(ks[0], ks[1], node_dim, node_dim * 3)
    w_g_t, b_g = lin(ks[2], ks[3], edge_dim, heads)
    w_upd_t, b_upd = lin(ks[4], ks[5], heads, edge_dim)
    w_out_t, b_out = lin(ks[6], ks[7], node_dim, node_dim)
    return dict(
        heads=heads,
        w_qkv_t=w_qkv_t, b_qkv=b_qkv,
        w_g_t=w_g_t, b_g=b_g,
        w_upd_t=w_upd_t, b_upd=b_upd,
        w_out_t=w_out_t, b_out=b_out,
    )


def reference_forward(params, node, sp, mask):
    B, T, N, D = node.shape
    E = sp.shape[-1]
    H = params["heads"]
    d_k = D // H
    BT = B * T

    qkv = node.reshape(BT, N, D) @ params["w_qkv_t"] + params["b_qkv"]
    qkv = qkv.reshape(BT, N, H, d_k, 3).transpose(0, 2, 1, 3, 4)
    q, k, v = qkv[..., 0], qkv[..., 1], qkv[..., 2]

    g = sp.reshape(BT, N, N, E) @ params["w_g_t"] + params["b_g"]
    g = g.transpose(0, 3, 1, 2)

    scores = jnp.einsum("bhnd,bhmd->bhnm", q, k) / math.sqrt(d_k) + g
    scores = jnp.clip(scores, -5.0, 5.0)
    m = mask.reshape(-1)[:, None, None, None]
    scores = jnp.where(m == 0, jnp.float32(1e-28), scores)
    attn = jax.nn.softmax(scores, axis=-1)
    attn = jnp.where(m == 0, 0.0, attn)
    x = jnp.einsum("bhnm,bhmd->bhnd", attn, v)

    x = x.transpose(0, 2, 1, 3).reshape(B, T, N, D)
    x = x @ params["w_out_t"] + params["b_out"]
    s = scores.transpose(0, 2, 3, 1)
    sp_out = (s @ params["w_upd_t"] + params["b_upd"]).reshape(B, T, N, N, E)
    return x, sp_out


# ----------------------------------------------------------------------------

if __name__ == "__main__":
    B, T, N, D, H, E = 2, 2, 8, 32, 4, 8

    key = jax.random.PRNGKey(0)
    k_node, k_sp, k_params = jax.random.split(key, 3)
    node = jax.random.normal(k_node, (B, T, N, D), jnp.float32)
    sp = jax.random.normal(k_sp, (B, T, N, N, E), jnp.float32)
    mask = jnp.array([[[1, 0]], [[1, 1]]], dtype=jnp.int32)  # (B, 1, T)

    params = init_params(k_params, D, E, H)

    x_out, sp_out = spatial_attention_forward(params, node, sp, mask)
    jax.block_until_ready((x_out, sp_out))

    x_ref, sp_ref = reference_forward(params, node, sp, mask)
    assert x_out.shape == (B, T, N, D) and sp_out.shape == (B, T, N, N, E)
    # x goes through the approx-reciprocal softmax -> slightly looser tolerance.
    assert jnp.allclose(x_out, x_ref, atol=2e-3, rtol=2e-3)
    # sp_out depends only on pre-softmax scores -> tight tolerance.
    assert jnp.allclose(sp_out, sp_ref, atol=1e-4, rtol=1e-4)

    print("KERNEL_OK")
</pallas_src>

<mosaic_0001>
module attributes {stable_mosaic.version = 11 : i64} {
  func.func @_linear_kernel(%arg0: i32, %arg1: i32, %arg2: memref<32x32xf32, #tpu.memory_space<vmem>>, %arg3: memref<32x96xf32, #tpu.memory_space<vmem>>, %arg4: memref<1x96xf32, #tpu.memory_space<vmem>>, %arg5: memref<32x96xf32, #tpu.memory_space<vmem>>) attributes {dimension_semantics = [#tpu.dimension_semantics<parallel>, #tpu.dimension_semantics<parallel>], iteration_bounds = array<i64: 1, 1>, scalar_prefetch = 0 : i64, scratch_operands = 0 : i64, tpu.core_type = #tpu.core_type<tc>, window_params = [{transform_indices = @transform_0, window_bounds = array<i64: 32, 32>}, {transform_indices = @transform_1, window_bounds = array<i64: 32, 96>}, {transform_indices = @transform_2, window_bounds = array<i64: 1, 96>}, {transform_indices = @transform_3, window_bounds = array<i64: 32, 96>}]} {
    %c0 = arith.constant 0 : index
    %c0_0 = arith.constant 0 : index
    %0 = vector.load %arg2[%c0, %c0_0] : memref<32x32xf32, #tpu.memory_space<vmem>>, vector<32x32xf32>
    %c0_1 = arith.constant 0 : index
    %c0_2 = arith.constant 0 : index
    %1 = vector.load %arg3[%c0_1, %c0_2] : memref<32x96xf32, #tpu.memory_space<vmem>>, vector<32x96xf32>
    %cst = arith.constant dense<0.000000e+00> : vector<32x96xf32>
    %2 = tpu.matmul %0, %1, %cst {dimension_numbers = #tpu.dot_dimension_numbers<[1], [0], [0], [1], [0, 0, 1, 1], [], []>} : vector<32x32xf32>, vector<32x96xf32>, vector<32x96xf32> -> vector<32x96xf32>
    %c0_3 = arith.constant 0 : index
    %c0_4 = arith.constant 0 : index
    %3 = vector.load %arg4[%c0_3, %c0_4] : memref<1x96xf32, #tpu.memory_space<vmem>>, vector<1x96xf32>
    %4 = vector.broadcast %3 : vector<1x96xf32> to vector<32x96xf32>
    %5 = arith.addf %2, %4 : vector<32x96xf32>
    %c0_5 = arith.constant 0 : index
    %c0_6 = arith.constant 0 : index
    %6 = vector.load %arg5[%c0_5, %c0_6] : memref<32x96xf32, #tpu.memory_space<vmem>>, vector<32x96xf32>
    tpu.vector_store %arg5[%c0_5, %c0_6], %5 {strides = array<i32>} : memref<32x96xf32, #tpu.memory_space<vmem>>, vector<32x96xf32>,
    return
  }
  func.func @transform_0(%arg0: i32, %arg1: i32) -> (i32, i32) {
    %c0_i32 = arith.constant 0 : i32
    %c0_i32_0 = arith.constant 0 : i32
    return %arg0, %c0_i32 : i32, i32
  }
  func.func @transform_1(%arg0: i32, %arg1: i32) -> (i32, i32) {
    %c0_i32 = arith.constant 0 : i32
    %c0_i32_0 = arith.constant 0 : i32
    return %c0_i32, %arg1 : i32, i32
  }
  func.func @transform_2(%arg0: i32, %arg1: i32) -> (i32, i32) {
    %c0_i32 = arith.constant 0 : i32
    %c0_i32_0 = arith.constant 0 : i32
    return %c0_i32, %arg1 : i32, i32
  }
  func.func @transform_3(%arg0: i32, %arg1: i32) -> (i32, i32) {
    %c0_i32 = arith.constant 0 : i32
    return %arg0, %arg1 : i32, i32
  }
}

</mosaic_0001>

<bundles_post_ra>
// kernel: tpu_custom_call.1
= control target key start
LH: loop header
LB: loop body
LE: loop exit
PB: predicated region body
PF: predicated region fallthrough
CT: control target
= control target key end

     0   :  { %8 = vsyncpa [#allocation3], 0  ;;  %s372_s0 = inlined_call_operand.hbm [shape: f32[32,32], index: 0, kind: input, shape index: {}]   ;;  %s373_s1 = inlined_call_operand.hbm [shape: f32[32,96], index: 1, kind: input, shape index: {}]   ;;  %s374_s2 = inlined_call_operand.vmem [shape: f32[1,96], index: 2, kind: input, shape index: {}]   ;;  %s375_s3 = inlined_call_operand.hbm [shape: f32[32,96], index: 3, kind: output, shape index: {}]  }
   0x1   :  { %9 = vsyncpa [#allocation6], 0 }
   0x2   :  { %10 = vsyncpa [#allocation4], 0  ;;  %s295_s12 = smov [#allocation2]   ;;  %s223_s16 = scalar_lea.hbm %s372_s0, 512 }
   0x3   :  { %s16_s13 = sshll.u32 %s295_s12, 4  ;;  %p224_p0 = scmp.ne.s32.totalorder %s372_s0, %s223_s16  ;;  %s17_s13 = int_to_ptr.vmem [resolvable:$true] %s16_s13 }
   0x4   :  { %p227_p1 = scmp.lt.u32.totalorder %s223_s16, %s372_s0 }
   0x6   :  { %p229_p2 = pnand %p227_p1, %p224_p0 }
   0x8   :  { %232 = shalt.err (!%p229_p2)
}
   0x9   :  { %s233_s21 = scalar_lea.vmem %s17_s13, 512  ;;  %p238_p4 = scmp.lt.s32.totalorder %s17_s13, %s17_s13 }
   0xa   :  { %p234_p3 = scmp.ne.s32.totalorder %s17_s13, %s233_s21  ;;  %p239_p5 = scmp.lt.s32.totalorder %s233_s21, %s233_s21 }
   0xc   :  { %p240_p6 = por %p239_p5, %p238_p4 }
   0xe   :  { %p241_p7 = pnand %p240_p6, %p234_p3 }
  0x10   :  { %244 = shalt.err (!%p241_p7)
}
  0x11   :  { %s296_s22 = smov 128   ;;  %s297_s23 = smov 8  }
  0x12   :  { %22 = dma.hbm_to_vmem [thread:$0]  %s372_s0, 512, %s17_s13, [#allocation3], %s296_s22, %s296_s22, %s297_s23  }
  0x13   :  { %s298_s26 = smov [#allocation5]   ;;  %s245_s30 = scalar_lea.hbm %s373_s1, 512 }
  0x14   :  { %s28_s27 = sshll.u32 %s298_s26, 4  ;;  %p246_p8 = scmp.ne.s32.totalorder %s373_s1, %s245_s30  ;;  %s29_s27 = int_to_ptr.vmem [resolvable:$true] %s28_s27 }
  0x15   :  { %p249_p9 = scmp.lt.u32.totalorder %s245_s30, %s373_s1 }
  0x17   :  { %p251_p10 = pnand %p249_p9, %p246_p8 }
  0x19   :  { %254 = shalt.err (!%p251_p10)
}
  0x1a   :  { %s255_s8 = scalar_lea.vmem %s29_s27, 512  ;;  %p260_p12 = scmp.lt.s32.totalorder %s29_s27, %s29_s27 }
  0x1b   :  { %p256_p11 = scmp.ne.s32.totalorder %s29_s27, %s255_s8  ;;  %p261_p13 = scmp.lt.s32.totalorder %s255_s8, %s255_s8 }
  0x1d   :  { %p262_p0 = por %p261_p13, %p260_p12 }
  0x1f   :  { %p263_p1 = pnand %p262_p0, %p256_p11 }
  0x21   :  { %266 = shalt.err (!%p263_p1)
}
  0x22   :  { %34 = dma.hbm_to_vmem [thread:$0]  %s373_s1, 512, %s29_s27, [#allocation6], %s296_s22, %s296_s22, %s297_s23  }
  0x23   :  { %289 = dma.done.wait [#allocation3], 512  }
  0x24   :  { %290 = vsyncadd [#allocation3], 4294966784 }
  0x25   :  { %291 = dma.done.wait [#allocation6], 512  }
  0x26   :  { %292 = vsyncadd [#allocation6], 4294966784  ;;  %vm58_vm0 = vcmask 261120   ;;  %v47_v0 = vld [vmem:[#allocation5] sm:$0xff]  ;;  %v48_v1 = vld [vmem:[#allocation5 + $0x8] sm:$0xff]  ;;  %s299_s11 = smov [#allocation7]  }
  0x27   :  { %v49_v2 = vld [vmem:[#allocation5 + $0x10] sm:$0xff]  ;;  %v206_v3 = vpack.c.bf16 %v48_v1, %v47_v0  ;;  %v50_v4 = vld [vmem:[#allocation5 + $0x18] sm:$0xff]  ;;  %v43_v5 = vld [vmem:[#allocation2] sm:$0xff]  ;;  %s166_s12 = sshll.u32 %s299_s11, 4  ;;  %vm156_vm1 = vcmask 785408   ;;  %s167_s12 = int_to_ptr.vmem [resolvable:$true] %s166_s12 }
  0x28   :  { %v45_v6 = vld [vmem:[#allocation2 + $0x10] sm:$0xff]  ;;  %v210_v7 = vpack.c.bf16 %v50_v4, %v49_v2  ;;  %200 = vmatprep.mubr.msk.f32.mxu0 %vm58_vm0, %v43_v5  ;;  %v44_v8 = vld [vmem:[#allocation2 + $0x8] sm:$0xff]  ;;  %v46_v9 = vld [vmem:[#allocation2 + $0x18] sm:$0xff]  ;;  %s267_s13 = scalar_lea.vmem %s167_s12, 512  ;;  %p272_p3 = scmp.lt.s32.totalorder %s167_s12, %s167_s12 }
  0x29   :  { %203 = vmatprep.mubr.msk.f32.mxu1 %vm58_vm0, %v45_v6  ;;  %207 = vmatprep.subr.bf16.mxu0 %v206_v3  ;;  %v179_v10 = vld [vmem:[%s374_s2] ss:$0 sm:$0xff]  ;;  %p268_p2 = scmp.ne.s32.totalorder %s167_s12, %s267_s13  ;;  %p273_p4 = scmp.lt.s32.totalorder %s267_s13, %s267_s13 }
  0x2a   :  { %214 = vmatprep.subr.bf16.mxu1 %v206_v3  ;;  %209 = vmatpush3.bf16.msra.mxu0 %v206_v3 }
  0x2b   :  { %216 = vmatpush3.bf16.msra.mxu1 %v206_v3  ;;  %211 = vmatprep.subr.bf16.mxu0 %v210_v7  ;;  %p274_p5 = por %p273_p4, %p272_p3 }
  0x2c   :  { %215 = vmatprep.subr.bf16.mxu1 %v210_v7 }
  0x2d   :  { %p275_p6 = pnand %p274_p5, %p268_p2 }
  0x2e   :  { %213 = vmatpush3.bf16.msra.mxu0 %v210_v7 }
  0x2f   :  { %217 = vmatpush3.bf16.msra.mxu1 %v210_v7 }
  0x31   :  { %201 = vmatmul.mubr.msk.f32.vlgmr.msra.gmra.mrb[0].mxu0 %vm58_vm0, %v44_v8 }
  0x32   :  { %204 = vmatmul.mubr.msk.f32.vlgmr.msra.gmra.mrb[0].mxu1 %vm58_vm0, %v46_v9 }
 0x104   :  { %v202_v11 = vpop.f32.mrb[0].mxu0 }
 0x105   :  { %v205_v12 = vpop.f32.mrb[0].mxu1  ;;  %v143_v13 = vadd.f32 %v202_v11, %v179_v10  ;;  %v137_v15 = vpop.f32.mrb[1].mxu0 }
 0x106   :  { %v153_v14 = vadd.f32 %v205_v12, %v179_v10  ;;  %v147_v16 = vpop.f32.mrb[1].mxu1  ;;  %v138_v17 = vadd.f32 %v179_v10, %v137_v15 }
 0x107   :  { %v148_v18 = vadd.f32 %v179_v10, %v147_v16  ;;  %158 = vst.msk [vmem:[#allocation7 + $0x8] sm:$0xff] %vm156_vm1, %v143_v13 }
 0x108   :  { %160 = vst.msk [vmem:[#allocation7 + $0x18] sm:$0xff] %vm156_vm1, %v153_v14  ;;  %157 = vst.msk [vmem:[#allocation7] sm:$0xff] %vm156_vm1, %v138_v17 }
 0x109   :  { %159 = vst.msk [vmem:[#allocation7 + $0x10] sm:$0xff] %vm156_vm1, %v148_v18 }
 0x10a   :  { %278 = shalt.err (!%p275_p6)
}
 0x10b   :  { %s279_s15 = scalar_lea.hbm %s375_s3, 512 }
 0x10c   :  { %p280_p7 = scmp.ne.s32.totalorder %s375_s3, %s279_s15  ;;  %p283_p8 = scmp.lt.u32.totalorder %s279_s15, %s375_s3 }
 0x10e   :  { %p285_p9 = pnand %p283_p8, %p280_p7 }
 0x110   :  { %288 = shalt.err (!%p285_p9)
}
 0x111   :  { %172 = dma.vmem_to_hbm [thread:$0]  %s167_s12, 512, %s375_s3, [#allocation4], %s296_s22, %s296_s22, %s297_s23  }
 0x112   :  { %293 = dma.done.wait [#allocation4], 512  }
 0x113   :  { %294 = vsyncadd [#allocation4], 4294966784 }
 0x114   :  { %176 = vsyncpa [#allocation3], 1 }
 0x115   :  { %177 = vsyncpa [#allocation6], 1 }
 0x116   :  { %178 = vsyncpa [#allocation4], 1 }

</bundles_post_ra>
